<compile_context>
chip_gen: v7x
topology: tpu7x:2x2x1
jax: 0.10.0
libtpu: 0.0.40
codegen_flags: <defaults>
</compile_context>

<pallas_src>
import jax
import jax.numpy as jnp
from jax import lax
from jax.experimental import pallas as pl
from jax.experimental.pallas import tpu as pltpu

N_EMBD = 128      # C, fixed by the module definition
NEG_BIG = -1e30   # finite "-inf" for the causal mask (no inf-inf NaN risk)


def _head_kernel(x_ref, w_ref, bias_ref, o_ref):
    # x_ref:    (Bt, T, C)       bfloat16 block of the batch
    # w_ref:    (C, Hp + 2H)     bfloat16 fused [Wv|pad, Wk, Wq] (grid resident)
    # bias_ref: (T, T)           float32 additive causal mask (0 / -1e30), resident
    # o_ref:    (Bt, T, Hp)      float32 lane-padded output slab
    Bt, T, C = x_ref.shape
    Hp = o_ref.shape[-1]
    H = (w_ref.shape[1] - Hp) // 2

    # --- fused projections: one MXU pass with M = Bt*T, K = C, N = Hp + 2H ---
    x2 = x_ref[...].reshape(Bt * T, C)                                 # bf16
    kqv = jnp.dot(x2, w_ref[...], preferred_element_type=jnp.float32)  # f32 acc
    kqv = kqv.astype(jnp.bfloat16)

    v = kqv[:, :Hp].reshape(Bt, T, Hp)              # lane-aligned slice
    k = kqv[:, Hp:Hp + H].reshape(Bt, T, H)
    q = kqv[:, Hp + H:Hp + 2 * H].reshape(Bt, T, H)

    # --- scaled causal scores (contract last dims; no explicit k.T) ----------
    scale = jnp.float32(C) ** jnp.float32(-0.5)
    wei = jnp.einsum('bqd,bkd->bqk', q, k,
                     preferred_element_type=jnp.float32) * scale       # (Bt,T,T)
    wei = wei + bias_ref[...][None, :, :]                              # causal mask

    # --- numerically stable softmax, kept in f32 (v5e VPU/EUP have no bf16) --
    m = jnp.max(wei, axis=-1, keepdims=True)
    p = jnp.exp(wei - m)
    denom = jnp.sum(p, axis=-1, keepdims=True)
    p = p * pl.reciprocal(denom, approx=True)

    # Dropout (p=0.4): identity in eval mode.
    # TODO(synk): training-mode dropout would use pltpu.prng_seed +
    # pltpu.stateful_bernoulli; omitted for eval semantics.

    # V columns beyond H are zero, so this directly yields the lane-padded
    # output slab -> unmasked stores.
    out = jnp.einsum('bqk,bkd->bqd', p.astype(jnp.bfloat16), v,
                     preferred_element_type=jnp.float32)               # (Bt,T,Hp)
    o_ref[...] = out.astype(o_ref.dtype)


def _pick_bt(B, T, C, Hp):
    """Batch elements per grid step: aim for >=256 rows in the fused projection
    (fills v6e/v7x's 256-wide MXU), keep >=2 grid steps when possible (megacore),
    keep the per-step working set well under the v7x scoped-VMEM budget, and
    make Bt a divisor of B (no padded blocks)."""
    bt = max(1, min(B, pl.cdiv(256, T)))
    if B >= 2:
        bt = max(1, min(bt, B // 2))
    # conservative VMEM cap on the dominant per-step buffers (scores + x + out)
    while bt > 1 and bt * T * (T + C + Hp) * 4 > (16 << 20):
        bt -= 1
    while B % bt:
        bt -= 1
    return bt


def head_forward(x, w_key, w_query, w_value):
    """x: (B, T, C) float32; w_*: (C, H) float32 (pre-transposed nn.Linear weights)."""
    B, T, C = x.shape
    assert C == N_EMBD
    H = w_key.shape[1]
    Hp = ((H + 127) // 128) * 128   # lane-dense (multiple-of-128) output width

    # Fuse + lane-pad the projection weights once, outside the kernel:
    # layout [Wv | zero-pad, Wk, Wq] so the V slice is lane-aligned in-kernel.
    w_v_pad = jnp.pad(w_value, ((0, 0), (0, Hp - H)))
    w_fused = jnp.concatenate([w_v_pad, w_key, w_query], axis=1).astype(jnp.bfloat16)

    # Precomputed additive causal mask (resident in VMEM across the grid).
    row = lax.broadcasted_iota(jnp.int32, (T, T), 0)
    col = lax.broadcasted_iota(jnp.int32, (T, T), 1)
    bias = jnp.where(col <= row, 0.0, NEG_BIG).astype(jnp.float32)

    # bf16 input halves the HBM->VMEM DMA bytes; matmuls are bf16 anyway.
    x_bf16 = x.astype(jnp.bfloat16)

    Bt = _pick_bt(B, T, C, Hp)
    grid = (B // Bt,)

    out_padded = pl.pallas_call(
        _head_kernel,
        out_shape=jax.ShapeDtypeStruct((B, T, Hp), jnp.float32),
        grid_spec=pltpu.PrefetchScalarGridSpec(
            num_scalar_prefetch=0,
            grid=grid,
            in_specs=[
                pl.BlockSpec((Bt, T, C), lambda b: (b, 0, 0)),
                pl.BlockSpec((C, Hp + 2 * H), lambda b: (0, 0)),
                pl.BlockSpec((T, T), lambda b: (0, 0)),
            ],
            out_specs=pl.BlockSpec((Bt, T, Hp), lambda b: (b, 0, 0)),
        ),
        compiler_params=pltpu.CompilerParams(
            dimension_semantics=("parallel",),
        ),
    )(x_bf16, w_fused, bias)

    return out_padded[..., :H] if Hp != H else out_padded


if __name__ == "__main__":
    # Small deterministic example consistent with the module:
    # B=2, T=8 (<= block_size=256), C=n_embd=128, head_size=32.
    B, T, C, head_size = 2, 8, N_EMBD, 32

    key = jax.random.PRNGKey(0)
    kx, kk, kq, kv = jax.random.split(key, 4)

    x = jax.random.normal(kx, (B, T, C), dtype=jnp.float32)
    # nn.Linear weight is (head_size, n_embd); we store the transpose (C, H).
    w_key = jax.random.normal(kk, (C, head_size), dtype=jnp.float32) * 0.02
    w_query = jax.random.normal(kq, (C, head_size), dtype=jnp.float32) * 0.02
    w_value = jax.random.normal(kv, (C, head_size), dtype=jnp.float32) * 0.02

    out = head_forward(x, w_key, w_query, w_value)
    jax.block_until_ready(out)

    # Pure-JAX f32 reference of the same forward pass.
    def ref(x, wk, wq, wv):
        k = x @ wk
        q = x @ wq
        v = x @ wv
        wei = (q @ jnp.swapaxes(k, -1, -2)) * (C ** -0.5)
        mask = jnp.tril(jnp.ones((T, T), dtype=bool))
        wei = jnp.where(mask, wei, -jnp.inf)
        wei = jax.nn.softmax(wei, axis=-1)
        return wei @ v

    expected = ref(x, w_key, w_query, w_value)
    assert out.shape == (B, T, head_size)
    # bf16 MXU inputs + approx reciprocal => compare at bf16-appropriate tolerance.
    assert jnp.allclose(out, expected, atol=2e-2, rtol=2e-2), (
        float(jnp.max(jnp.abs(out - expected))))

    print("KERNEL_OK")
</pallas_src>

<mosaic_0001>
module attributes {stable_mosaic.version = 11 : i64} {
  func.func @_head_kernel(%arg0: i32, %arg1: memref<1x8x128xbf16, #tpu.memory_space<vmem>>, %arg2: memref<128x192xbf16, #tpu.memory_space<vmem>>, %arg3: memref<8x8xf32, #tpu.memory_space<vmem>>, %arg4: memref<1x8x128xf32, #tpu.memory_space<vmem>>) attributes {dimension_semantics = [#tpu.dimension_semantics<parallel>], iteration_bounds = array<i64: 2>, scalar_prefetch = 0 : i64, scratch_operands = 0 : i64, tpu.core_type = #tpu.core_type<tc>, window_params = [{transform_indices = @transform_0, window_bounds = array<i64: 1, 8, 128>}, {pipeline_mode = #tpu.pipeline_mode<synchronous>, transform_indices = @transform_1, window_bounds = array<i64: 128, 192>}, {pipeline_mode = #tpu.pipeline_mode<synchronous>, transform_indices = @transform_2, window_bounds = array<i64: 8, 8>}, {transform_indices = @transform_3, window_bounds = array<i64: 1, 8, 128>}]} {
    %c0 = arith.constant 0 : index
    %c0_0 = arith.constant 0 : index
    %c0_1 = arith.constant 0 : index
    %0 = vector.load %arg1[%c0, %c0_0, %c0_1] : memref<1x8x128xbf16, #tpu.memory_space<vmem>>, vector<1x8x128xbf16>
    %1 = vector.shape_cast %0 : vector<1x8x128xbf16> to vector<8x128xbf16>
    %c0_2 = arith.constant 0 : index
    %c0_3 = arith.constant 0 : index
    %2 = vector.load %arg2[%c0_2, %c0_3] : memref<128x192xbf16, #tpu.memory_space<vmem>>, vector<128x192xbf16>
    %cst = arith.constant dense<0.000000e+00> : vector<8x192xf32>
    %3 = tpu.matmul %1, %2, %cst {dimension_numbers = #tpu.dot_dimension_numbers<[1], [0], [0], [1], [0, 0, 1, 1], [], []>} : vector<8x128xbf16>, vector<128x192xbf16>, vector<8x192xf32> -> vector<8x192xf32>
    %4 = arith.truncf %3 : vector<8x192xf32> to vector<8x192xbf16>
    %5 = vector.extract_strided_slice %4 {offsets = [0, 0], sizes = [8, 128], strides = [1, 1]} : vector<8x192xbf16> to vector<8x128xbf16>
    %6 = vector.shape_cast %5 : vector<8x128xbf16> to vector<1x8x128xbf16>
    %7 = vector.extract_strided_slice %4 {offsets = [0, 128], sizes = [8, 32], strides = [1, 1]} : vector<8x192xbf16> to vector<8x32xbf16>
    %8 = vector.shape_cast %7 : vector<8x32xbf16> to vector<1x8x32xbf16>
    %9 = vector.extract_strided_slice %4 {offsets = [0, 160], sizes = [8, 32], strides = [1, 1]} : vector<8x192xbf16> to vector<8x32xbf16>
    %10 = vector.shape_cast %9 : vector<8x32xbf16> to vector<1x8x32xbf16>
    %cst_4 = arith.constant 1.280000e+02 : f32
    %cst_5 = arith.constant -5.000000e-01 : f32
    %11 = math.powf %cst_4, %cst_5 : f32
    "tpu.trace_start"() <{level = 10 : i32, message = "bqd,bkd->bqk"}> : () -> ()
    %cst_6 = arith.constant dense<0.000000e+00> : vector<1x8x8xf32>
    %12 = tpu.matmul %10, %8, %cst_6 {dimension_numbers = #tpu.dot_dimension_numbers<[2], [2], [1], [1], [0, 0, 0, 1, 1, 1], [0], [0]>} : vector<1x8x32xbf16>, vector<1x8x32xbf16>, vector<1x8x8xf32> -> vector<1x8x8xf32>
    "tpu.trace_stop"() : () -> ()
    %13 = vector.broadcast %11 : f32 to vector<1x8x8xf32>
    %14 = arith.mulf %12, %13 : vector<1x8x8xf32>
    %c0_7 = arith.constant 0 : index
    %c0_8 = arith.constant 0 : index
    %15 = vector.load %arg3[%c0_7, %c0_8] : memref<8x8xf32, #tpu.memory_space<vmem>>, vector<8x8xf32>
    %16 = vector.shape_cast %15 : vector<8x8xf32> to vector<1x8x8xf32>
    %17 = arith.addf %14, %16 : vector<1x8x8xf32>
    %cst_9 = arith.constant dense<0xFF800000> : vector<1x8xf32>
    %18 = vector.multi_reduction <maximumf>, %17, %cst_9 [2] : vector<1x8x8xf32> to vector<1x8xf32>
    %19 = vector.shape_cast %18 : vector<1x8xf32> to vector<1x8x1xf32>
    %20 = vector.broadcast %19 : vector<1x8x1xf32> to vector<1x8x8xf32>
    %21 = arith.subf %17, %20 : vector<1x8x8xf32>
    %22 = math.exp %21 : vector<1x8x8xf32>
    %cst_10 = arith.constant dense<0.000000e+00> : vector<1x8xf32>
    %23 = vector.multi_reduction <add>, %22, %cst_10 [2] : vector<1x8x8xf32> to vector<1x8xf32>
    %24 = vector.shape_cast %23 : vector<1x8xf32> to vector<1x8x1xf32>
    %25 = tpu.reciprocal %24 {approx = true} : vector<1x8x1xf32> -> vector<1x8x1xf32>
    %26 = vector.broadcast %25 : vector<1x8x1xf32> to vector<1x8x8xf32>
    %27 = arith.mulf %22, %26 : vector<1x8x8xf32>
    %28 = arith.truncf %27 : vector<1x8x8xf32> to vector<1x8x8xbf16>
    "tpu.trace_start"() <{level = 10 : i32, message = "bqk,bkd->bqd"}> : () -> ()
    %cst_11 = arith.constant dense<0.000000e+00> : vector<1x8x128xf32>
    %29 = tpu.matmul %28, %6, %cst_11 {dimension_numbers = #tpu.dot_dimension_numbers<[2], [1], [1], [2], [0, 0, 0, 1, 1, 2], [0], [0]>} : vector<1x8x8xbf16>, vector<1x8x128xbf16>, vector<1x8x128xf32> -> vector<1x8x128xf32>
    "tpu.trace_stop"() : () -> ()
    %c0_12 = arith.constant 0 : index
    %c0_13 = arith.constant 0 : index
    %c0_14 = arith.constant 0 : index
    %30 = vector.load %arg4[%c0_12, %c0_13, %c0_14] : memref<1x8x128xf32, #tpu.memory_space<vmem>>, vector<1x8x128xf32>
    tpu.vector_store %arg4[%c0_12, %c0_13, %c0_14], %29 {strides = array<i32>} : memref<1x8x128xf32, #tpu.memory_space<vmem>>, vector<1x8x128xf32>,
    return
  }
  func.func @transform_0(%arg0: i32) -> (i32, i32, i32) {
    %c0_i32 = arith.constant 0 : i32
    %c0_i32_0 = arith.constant 0 : i32
    %c0_i32_1 = arith.constant 0 : i32
    return %arg0, %c0_i32, %c0_i32_0 : i32, i32, i32
  }
  func.func @transform_1(%arg0: i32) -> (i32, i32) {
    %c0_i32 = arith.constant 0 : i32
    %c0_i32_0 = arith.constant 0 : i32
    %c0_i32_1 = arith.constant 0 : i32
    return %c0_i32, %c0_i32_0 : i32, i32
  }
  func.func @transform_2(%arg0: i32) -> (i32, i32) {
    %c0_i32 = arith.constant 0 : i32
    %c0_i32_0 = arith.constant 0 : i32
    %c0_i32_1 = arith.constant 0 : i32
    return %c0_i32, %c0_i32_0 : i32, i32
  }
  func.func @transform_3(%arg0: i32) -> (i32, i32, i32) {
    %c0_i32 = arith.constant 0 : i32
    %c0_i32_0 = arith.constant 0 : i32
    %c0_i32_1 = arith.constant 0 : i32
    return %arg0, %c0_i32, %c0_i32_0 : i32, i32, i32
  }
}

</mosaic_0001>

<bundles_post_ra>
// kernel: tpu_custom_call.1
= control target key start
LH: loop header
LB: loop body
LE: loop exit
PB: predicated region body
PF: predicated region fallthrough
CT: control target
= control target key end

     0   :  { %8 = vsyncpa [#allocation3], 0  ;;  %s854_s0 = inlined_call_operand.vmem [shape: bf16[2,8,128], index: 0, kind: input, shape index: {}]   ;;  %s855_s1 = inlined_call_operand.vmem [shape: bf16[128,192], index: 1, kind: input, shape index: {}]   ;;  %s856_s2 = inlined_call_operand.vmem [shape: f32[8,8], index: 2, kind: input, shape index: {}]   ;;  %s857_s3 = inlined_call_operand.hbm [shape: f32[2,8,128], index: 3, kind: output, shape index: {}]  }
   0x1   :  { %10 = vsyncpa [#allocation3 + $0x1], 0  ;;  %s698_s12 = smov 0   ;;  %s700_s13 = smov 0  }
   0x2   :  { %s702_s14 = smov 0   ;;  %s704_s15 = smov 0  }
   0x3 LB: > { %s719_s16 = sadd.s32 4294967295, %s671_s15   ;;  %s494_s17 = sadd.s32 4294967294, %s671_s15   ;;  %s671_s15 = sphi %s704_s15, %s863_s15   ;;  %s667_s14 = sphi %s702_s14, %s862_s14   ;;  %s663_s13 = sphi %s700_s13, %s861_s13   ;;  %s659_s12 = sphi %s698_s12, %s860_s12  }
   0x4   : > { %s723_s18 = sadd.s32 1, %s671_s15   ;;  %s91_s19 = sadd.s32 1, %s667_s14 }
   0x5   : > { %s88_s20 = ssub.s32 %s671_s15, %s723_s18  ;;  %p101_p0 = scmp.ne.s32.totalorder %s667_s14, %s663_s13 }
   0x6   : > { %p89_p1 = scmp.eq.s32.totalorder %s88_s20, 0  ;;  %p102_p2 = scmp.eq.s32.totalorder %s719_s16, 1 }
   0x7   : > { %p107_p3 = scmp.ne.s32.totalorder %s663_s13, %s659_s12  ;;  %p108_p4 = scmp.eq.s32.totalorder %s494_s17, 1 }
   0x8   : > { %s734_s21 = scalar_select %p89_p1, %s667_s14, %s91_s19  }
   0x9   : > { %p736_p5 = por %p102_p2, %p101_p0  ;;  %p740_p6 = por %p108_p4, %p107_p3 }
   0xa   : > { %p497_p7 = scmp.ge.s32.totalorder %s671_s15, 1  ;;  %p139_p8 = scmp.lt.s32.totalorder %s671_s15, 3 }
   0xc   : > { %p140_p9 = pnand %p497_p7, %p139_p8 }
   0xd   : > { %v581_v0 = vld [vmem:[%s855_s1 + $0x4] ss:$8 sps:$4 sm:$0xff] (!%p140_p9)   ;;  %v583_v1 = vld [vmem:[%s855_s1] ss:$8 sps:$4 sm:$0xff] (!%p140_p9)   ;;  %v673_v2 = vmov (!%p140_p9), 0   ;;  %p162_p10 = scmp.lt.s32.totalorder (!%p140_p9), %s719_s16, 1 }
   0xe   : > { %143 = sbr.rel (%p140_p9) target bundleno = 1135 (0x46f), region = 32  ;;  %296 = vmatprep.mubr.bf16.mxu0 (!%p140_p9), %v673_v2  ;;  %264 = vmatprep.subr.bf16.mxu0 (!%p140_p9), %v581_v0  ;;  %v584_v3 = vld [vmem:[%s855_s1 + $0x14] ss:$8 sps:$4 sm:$0xff] (!%p140_p9)   ;;  %v586_v4 = vld [vmem:[%s855_s1 + $0x10] ss:$8 sps:$4 sm:$0xff] (!%p140_p9)   ;;  %v674_v18 = vmov (!%p140_p9), 0.0  }
   0xf   : > { %265 = vmatpush1.bf16.msra.mxu0 (!%p140_p9), %v583_v1  ;;  %v587_v5 = vld [vmem:[%s855_s1 + $0x24] ss:$8 sps:$4 sm:$0xff] (!%p140_p9)   ;;  %v589_v6 = vld [vmem:[%s855_s1 + $0x20] ss:$8 sps:$4 sm:$0xff] (!%p140_p9)   ;;  %v590_v7 = vld [vmem:[%s855_s1 + $0x34] ss:$8 sps:$4 sm:$0xff] (!%p140_p9)   ;;  %526 = vmatprep.subr.bf16.mxu1 (!%p140_p9), %v674_v18 }
  0x10   : > { %266 = vmatprep.subr.bf16.mxu0 (!%p140_p9), %v584_v3  ;;  %v592_v8 = vld [vmem:[%s855_s1 + $0x30] ss:$8 sps:$4 sm:$0xff] (!%p140_p9)   ;;  %v593_v9 = vld [vmem:[%s855_s1 + $0x44] ss:$8 sps:$4 sm:$0xff] (!%p140_p9)   ;;  %v595_v10 = vld [vmem:[%s855_s1 + $0x40] ss:$8 sps:$4 sm:$0xff] (!%p140_p9)  }
  0x11   : > { %v596_v11 = vld [vmem:[%s855_s1 + $0x54] ss:$8 sps:$4 sm:$0xff] (!%p140_p9)   ;;  %v598_v12 = vld [vmem:[%s855_s1 + $0x50] ss:$8 sps:$4 sm:$0xff] (!%p140_p9)   ;;  %v599_v13 = vld [vmem:[%s855_s1 + $0x64] ss:$8 sps:$4 sm:$0xff] (!%p140_p9)  }
  0x12   : > { %v601_v14 = vld [vmem:[%s855_s1 + $0x60] ss:$8 sps:$4 sm:$0xff] (!%p140_p9)   ;;  %v602_v15 = vld [vmem:[%s855_s1 + $0x74] ss:$8 sps:$4 sm:$0xff] (!%p140_p9)   ;;  %v604_v16 = vld [vmem:[%s855_s1 + $0x70] ss:$8 sps:$4 sm:$0xff] (!%p140_p9)  }
  0x13   : > { %267 = vmatpush1.bf16.msra.mxu0 (!%p140_p9), %v586_v4  ;;  %vm675_vm0 = vmmov (!%p140_p9), 0   ;;  %vm310_vm1 = vcmask (!%p140_p9), 261120   ;;  %s676_s25 = smov (!%p140_p9), 96   ;;  %vm376_vm2 = vcmask (!%p140_p9), 1043456   ;;  %v358_v29 = vld [vmem:[%s856_s2] sm:$0xff] (!%p140_p9)  ;;  %vm360_vm3 = vcmask (!%p140_p9), 64512  }
  0x14   : > { %268 = vmatprep.subr.bf16.mxu0 (!%p140_p9), %v587_v5  ;;  %528 = vmatprep.mubr.msk.bf16.mxu1 (!%p140_p9), %vm675_vm0, %v674_v18  ;;  %s159_s28 = sand.u32 (!%p140_p9), 1, %s663_s13  }
  0x15   : > { %s163_s5 = scalar_select %p162_p10, %s719_s16, 1 }
  0x16   : > { %s498_s29 = sshll.u32 %s159_s28, 3  ;;  %s422_s9 = scalar_lea.sflag [#allocation3], %s159_s28 }
  0x17   : > { %269 = vmatpush1.bf16.msra.mxu0 %v589_v6  ;;  %s499_s10 = sshll.u32 %s163_s5, 2  ;;  %s161_s30 = scalar_lea.vmem [#allocation2], %s498_s29 }
  0x18   : > { %270 = vmatprep.subr.bf16.mxu0 %v590_v7  ;;  %s165_s24 = scalar_lea.vmem %s854_s0, %s499_s10  ;;  %s435_s4 = sshll.u32 %s161_s30, 4  ;;  %s809_s4 = int_to_ptr.vmem [resolvable:$true] %s435_s4 }
  0x19   : > { %v167_v17 = vld [vmem:[%s165_s24] sm:$0xf]  ;;  %s519_s5 = sshll.u32 %s719_s16, 7  ;;  %s609_s10 = scalar_lea.vmem %s809_s4, 128 }
  0x1a   : > { %s814_s8 = scalar_lea.hbm %s857_s3, %s519_s5  ;;  %p610_p11 = scmp.ne.s32.totalorder %s809_s4, %s609_s10 }
  0x1b   : > { %271 = vmatpush1.bf16.msra.mxu0 %v592_v8  ;;  %s677_s16 = smov [#allocation2]  }
  0x1c   : > { %272 = vmatprep.subr.bf16.mxu0 %v593_v9  ;;  %p611_p12 = pnand %p610_p11, %p736_p5  ;;  %s613_s11 = sshll.u32 %s677_s16, 4  ;;  %s614_s11 = int_to_ptr.vmem [resolvable:$false] %s613_s11 }
  0x1d   : > { %s615_s17 = scalar_lea.vmem %s614_s11, 256  ;;  %p616_p0 = scmp.lt.s32.totalorder %s809_s4, %s614_s11 }
  0x1e   : > { %p612_p13 = pneg %p611_p12  ;;  %p617_p1 = scmp.lt.s32.totalorder %s615_s17, %s609_s10 }
  0x1f   : > { %273 = vmatpush1.bf16.msra.mxu0 %v595_v10 }
  0x20   : > { %274 = vmatprep.subr.bf16.mxu0 %v596_v11  ;;  %p618_p2 = por %p617_p1, %p616_p0 }
  0x22   : > { %p619_p3 = pnand %p618_p2, %p612_p13 }
  0x23   : > { %275 = vmatpush1.bf16.msra.mxu0 %v598_v12 }
  0x24   : > { %276 = vmatprep.subr.bf16.mxu0 %v599_v13 }
  0x27   : > { %277 = vmatpush1.bf16.msra.mxu0 %v601_v14 }
  0x28   : > { %278 = vmatprep.subr.bf16.mxu0 %v602_v15 }
  0x2b   : > { %279 = vmatpush1.bf16.msra.mxu0 %v604_v16 }
  0x2e   : > { %297 = vmatmul.mubr.bf16.vlgmr.msra.gmra.mrb[0].mxu0 %v167_v17 }
 0x101   : > { %v298_v19 = vpop.f32.mrb[0].mxu0 }
 0x102   : > { %v300_v20 = vpop.f32.mrb[1].mxu0  ;;  %v305_v25 = vpack.c.bf16 %v298_v19, %v298_v19 }
 0x103   : > { %v306_v21 = vpack.c.bf16 %v300_v20, %v300_v20  ;;  %v302_v22 = vpop.f32.mrb[2].mxu0 }
 0x104   : > { %v303_v23 = vpop.f32.mrb[3].mxu0  ;;  %v378_v27 = vsel %vm376_vm2, %v305_v25, 0 }
 0x105   : > { %308 = vrot.lane.b32.xlu0 %v306_v21, %s676_s25  ;;  %v315_v24 = vsel %vm310_vm1, %v306_v21, 0 }
 0x106   : > { %527 = vmatpush3.bf16.xpose.msra.mxu1 %v315_v24 }
 0x107   : > { %532 = vmatprep.subr.bf16.mxu1 %v674_v18 }
 0x177   : > { %v309_v26 = vpop.permute.xlu0 %308 }
 0x178   : > { %529 = vmatmul.mubr.msk.bf16.vlgmr.msra.gmra.mrb[0].mxu1 %vm310_vm1, %v309_v26 }
 0x179   : > { %533 = vmatpush3.bf16.msra.mxu1 %v378_v27  ;;  %534 = vmatprep.mubr.msk.bf16.mxu1 %vm675_vm0, %v674_v18 }
 0x24b   : > { %v351_v28 = vpop.f32.mrb[0].mxu1 }
 0x24c   : > { %v357_v30 = vmul.f32 0.088388346, %v351_v28  ;;  %v530_v31 = vpop.f32.mrb[1].mxu1 }
 0x24d   : > { %v354_v32 = vpop.f32.mrb[2].mxu1 }
 0x24e   : > { %v531_v33 = vpop.f32.mrb[3].mxu1  ;;  %v359_v34 = vadd.f32 %v358_v29, %v357_v30 }
 0x250   : > { %v361_v35 = vsel %vm360_vm3, %v359_v34, -inf }
 0x251   : > { %362 = vmax.xlane.f32.xlu0 %v361_v35 }
 0x2de   : > { %v363_v36 = vpop.xlane.xlu0 %362 }
 0x2df   : > { %v364_v37 = vsub.f32 %v359_v34, %v363_v36 }
 0x2e1   : > { %v365_v38 = vmul.f32 1.442695, %v364_v37 }
 0x2e3   : > { %605 = vpow2.f32 %v365_v38 }
 0x2ed   : > { %v606_v39 = vpop.eup %605 }
 0x2ee   : > { %v367_v40 = vsel %vm360_vm3, %v606_v39, 0.0 }
 0x2ef   : > { %368 = vadd.xlane.f32.xlu1 %v367_v40 }
 0x37c   : > { %v369_v41 = vpop.xlane.xlu1 %368 }
 0x37d   : > { %607 = vrcp.f32 %v369_v41 }
 0x387   : > { %v608_v42 = vpop.eup %607 }
 0x388   : > { %v371_v43 = vmul.f32 %v608_v42, %v606_v39 }
 0x38a   : > { %v372_v44 = vpack.c.bf16 %v371_v43, %v371_v43 }
 0x38c   : > { %535 = vmatmul.mubr.msk.bf16.vlgmr.msra.gmra.mrb[4].mxu1 %vm360_vm3, %v372_v44 }
 0x45f   : > { %v414_v45 = vpop.f32.mrb[4].mxu1 }
 0x460   : > { %420 = vst [vmem:[%s161_s30] sm:$0xff] %v414_v45  ;;  %v536_v46 = vpop.f32.mrb[5].mxu1 }
 0x461   : > { %v417_v47 = vpop.f32.mrb[6].mxu1 }
 0x462   : > { %622 = shalt.err (!%p619_p3)
}
 0x463   : > { %s623_s19 = scalar_lea.hbm %s814_s8, 128  ;;  %s627_s25 = scalar_lea.hbm %s857_s3, 256 }
 0x464   : > { %p624_p4 = scmp.ne.s32.totalorder %s814_s8, %s623_s19  ;;  %p628_p9 = scmp.lt.u32.totalorder %s814_s8, %s857_s3 }
 0x465   : > { %p629_p10 = scmp.lt.u32.totalorder %s627_s25, %s623_s19  ;;  %p631_p12 = scmp.lt.u32.totalorder %s623_s19, %s814_s8 }
 0x466   : > { %p625_p7 = pnand %p624_p4, %p736_p5 }
 0x467   : > { %p630_p11 = por %p629_p10, %p628_p9 }
 0x468   : > { %p626_p8 = pneg %p625_p7 }
 0x469   : > { %p632_p13 = por %p631_p12, %p630_p11 }
 0x46b   : > { %p633_p0 = pnand %p632_p13, %p626_p8 }
 0x46d   : > { %636 = shalt.err (!%p633_p0)
}
 0x46e   : > { %538 = dma.vmem_to_hbm [thread:$0]  (%p736_p5), %s809_s4, 128, %s814_s8, %s422_s9   ;;  %v537_v48 = vpop.f32.mrb[7].mxu1 }
 0x46f PF: > { %p544_p1 = scmp.ge.s32.totalorder %s671_s15, 2  ;;  %s447_s28 = sand.u32 1, %s659_s12  }
 0x470   : > { %s448_s29 = scalar_lea.sflag [#allocation3], %s447_s28 }
 0x471   : > { %p541_p2 = pnand %p544_p1, %p740_p6 }
 0x473   : > { %654 = dma.done.wait (!%p541_p2), %s448_s29, 128  }
 0x474   : > { %656 = vsyncadd (!%p541_p2), %s448_s29, 4294967168  ;;  %p13_p3 = scmp.ge.s32.totalorder %s723_s18, 4   ;;  %s860_s12 = smov %s663_s13 }
 0x475   : > { %s861_s13 = smov %s667_s14  ;;  %s862_s14 = smov %s734_s21 }
 0x476   : > { %s863_s15 = smov %s723_s18  ;;  %15 = sbr.rel (!%p13_p3) target bundleno = 3 (0x3), region = 67 }
 0x47d   :  { %453 = vsyncpa [#allocation3], 1 }
 0x47e   :  { %455 = vsyncpa [#allocation3 + $0x1], 1 }

</bundles_post_ra>
